<compile_context>
chip_gen: v5e
topology: v5e:2x2
jax: 0.10.0
libtpu: 0.0.40
codegen_flags: <defaults>
</compile_context>

<pallas_src>
import math

import jax
import jax.numpy as jnp
import numpy as np
from jax import lax
from jax.experimental import pallas as pl
from jax.experimental.pallas import tpu as pltpu


def _pick_tile(n, cap):
    """Largest tile <= cap that divides n and is sublane-friendly."""
    cap = min(n, cap)
    for t in range(cap, 0, -1):
        if n % t == 0 and (t % 8 == 0 or t == n):
            return t
    return n


# --------------- kernel 1: shared conv1 linear  h1 = X @ W1^T -------------------
def _lin_kernel(x_ref, w_ref, o_ref):
    # w is PyTorch (out, in); contract on its dim 1 -> no transpose in kernel.
    o_ref[...] = lax.dot_general(
        x_ref[...], w_ref[...],
        dimension_numbers=(((1,), (1,)), ((), ())),
        preferred_element_type=jnp.float32)


# ------- kernel 2: per-anchor star-graph GCN propagation + pool + concat --------
def _make_gcn_kernel(N, F, TA, radius):
    r2 = float(radius) * float(radius)
    inv_sqrt2 = 1.0 / math.sqrt(2.0)

    def kernel(desc_ref, c_ref, ct_ref, h1_ref, w2_ref, b1_ref, b2_ref, o_ref):
        a0 = pl.multiple_of(pl.program_id(0) * TA, TA)   # first anchor of this tile

        cA = c_ref[pl.ds(a0, TA), :]          # (TA, 3) anchor centers
        h1 = h1_ref[...]                      # (N, F)   shared X @ W1^T
        h1A = h1_ref[pl.ds(a0, TA), :]        # (TA, F)  anchor rows of h1
        b1 = b1_ref[...]                      # (1, F)
        b2 = b2_ref[...]                      # (1, F)
        w2 = w2_ref[...]                      # (F, F)   PyTorch (out, in) layout

        # --- squared distances anchor -> every node, pure VPU broadcast math ---
        dist2 = jnp.zeros((TA, N), jnp.float32)
        for d in range(3):                                   # static unroll, 3 coords
            diff = cA[:, d:d + 1] - ct_ref[d:d + 1, :]       # (TA,1)-(1,N) -> (TA,N)
            dist2 = dist2 + diff * diff

        node_idx = lax.broadcasted_iota(jnp.int32, (TA, N), 1)
        anchor_idx = a0 + lax.broadcasted_iota(jnp.int32, (TA, N), 0)
        is_anchor = node_idx == anchor_idx                   # one-hot per graph
        nbr = (dist2 <= r2) & (~is_anchor)                   # radius mask, no self edge

        # GCNConv normalisation for the star graph (self-loops included):
        inv_deg = jnp.where(nbr, 0.5, 1.0)      # 1/deg(i)
        wgt = jnp.where(nbr, inv_sqrt2, 0.0)    # 1/sqrt(deg(i)*deg(anchor))

        # --- conv1 propagation, batched over the TA anchor graphs ---
        x1 = (inv_deg[:, :, None] * h1[None, :, :]
              + wgt[:, :, None] * h1A[:, None, :]
              + b1[None, :, :])                               # (TA, N, F)

        # --- conv2 linear: one big (TA*N, F) @ (F, F) matmul (M fills the MXU) ---
        h2 = lax.dot_general(
            x1.reshape(TA * N, F), w2,
            dimension_numbers=(((1,), (1,)), ((), ())),
            preferred_element_type=jnp.float32).reshape(TA, N, F)

        # anchor row of each graph after the conv2 linear: since
        # x1[a, anchor_a] = h1[anchor_a] + b1, it is already a row of h2 —
        # extract it with a one-hot mask reduction (no extra MXU pass).
        h2_anchor = jnp.sum(
            jnp.where(is_anchor[:, :, None], h2, 0.0), axis=1)        # (TA, F)

        # --- conv2 propagation + global mean pool over the N nodes of each graph ---
        x2 = (inv_deg[:, :, None] * h2
              + wgt[:, :, None] * h2_anchor[:, None, :]
              + b2[None, :, :])                               # (TA, N, F)
        pooled = jnp.mean(x2, axis=1)                         # (TA, F)

        # fused torch.cat((descriptors, nn_descriptors), dim=1):
        # both column offsets are 128-aligned (F % 128 == 0) -> unmasked stores.
        o_ref[:, :F] = desc_ref[...]
        o_ref[:, F:] = pooled

    return kernel


# ----------------------------------- wrapper ------------------------------------
def gcn_neck_forward(centers, descriptors, params, graph_radius):
    centers = centers.astype(jnp.float32)
    descriptors = descriptors.astype(jnp.float32)
    N, F = descriptors.shape

    # stage 1: shared conv1 linear, row-tiled parallel grid
    TN = _pick_tile(N, 256)
    h1 = pl.pallas_call(
        _lin_kernel,
        out_shape=jax.ShapeDtypeStruct((N, F), jnp.float32),
        grid=(N // TN,),
        in_specs=[pl.BlockSpec((TN, F), lambda i: (i, 0)),
                  pl.BlockSpec((F, F), lambda i: (0, 0))],
        out_specs=pl.BlockSpec((TN, F), lambda i: (i, 0)),
        compiler_params=pltpu.CompilerParams(dimension_semantics=("parallel",)),
    )(descriptors, params["w1"])

    # stage 2: per-anchor-tile star-graph propagation (both convs) + pool + concat
    TA = _pick_tile(N, 8)
    centers_t = centers.T                       # (3, N), tiny one-off layout helper
    out = pl.pallas_call(
        _make_gcn_kernel(N, F, TA, graph_radius),
        out_shape=jax.ShapeDtypeStruct((N, 2 * F), jnp.float32),
        grid=(N // TA,),
        in_specs=[pl.BlockSpec((TA, F), lambda a: (a, 0)),     # descriptors tile
                  pl.BlockSpec((N, 3), lambda a: (0, 0)),      # centers
                  pl.BlockSpec((3, N), lambda a: (0, 0)),      # centers^T
                  pl.BlockSpec((N, F), lambda a: (0, 0)),      # h1 (full, resident)
                  pl.BlockSpec((F, F), lambda a: (0, 0)),      # w2
                  pl.BlockSpec((1, F), lambda a: (0, 0)),      # b1
                  pl.BlockSpec((1, F), lambda a: (0, 0))],     # b2
        out_specs=pl.BlockSpec((TA, 2 * F), lambda a: (a, 0)),
        compiler_params=pltpu.CompilerParams(dimension_semantics=("parallel",)),
    )(descriptors, centers, centers_t, h1, params["w2"], params["b1"], params["b2"])
    return out


# --------------------------- pure-JAX reference (check) --------------------------
def reference(centers, descriptors, params, graph_radius):
    N, F = descriptors.shape
    w1, b1 = params["w1"], params["b1"][0]
    w2, b2 = params["w2"], params["b2"][0]

    d2 = jnp.sum((centers[:, None, :] - centers[None, :, :]) ** 2, axis=-1)
    nbr = (d2 <= graph_radius ** 2) & (~jnp.eye(N, dtype=bool))
    eye = jnp.eye(N, dtype=jnp.float32)

    def per_graph(nbr_row, anchor_onehot):
        # dense adjacency in (target, source) orientation: edges anchor -> neighbour
        A = nbr_row[:, None].astype(jnp.float32) * anchor_onehot[None, :] + eye
        deg = jnp.sum(A, axis=1)                       # in-degree incl. self-loop
        dis = 1.0 / jnp.sqrt(deg)
        An = A * dis[:, None] * dis[None, :]
        x1 = An @ (descriptors @ w1.T) + b1            # GCNConv 1
        x2 = An @ (x1 @ w2.T) + b2                     # GCNConv 2
        return jnp.mean(x2, axis=0)                    # global_mean_pool

    g = jax.vmap(per_graph)(nbr, eye)                  # (N, F)
    return jnp.concatenate([descriptors, g], axis=1)   # (N, 2F)


# --------------------------------- param init ------------------------------------
def init_params(key, desc_len):
    ks = jax.random.split(key, 4)
    s = 0.1
    return {
        "w1": jax.random.normal(ks[0], (desc_len, desc_len), jnp.float32) * s,
        "b1": jax.random.normal(ks[1], (1, desc_len), jnp.float32) * s,
        "w2": jax.random.normal(ks[2], (desc_len, desc_len), jnp.float32) * s,
        "b2": jax.random.normal(ks[3], (1, desc_len), jnp.float32) * s,
    }


if __name__ == "__main__":
    # small shapes: batch of N=16 samples (=> 16 star graphs of 16 nodes),
    # desc_len=128 descriptors, 3-D centers, graph_radius=3.0
    N, DESC = 16, 128
    RADIUS = 3.0

    key = jax.random.PRNGKey(0)
    kc, kd, kp = jax.random.split(key, 3)
    centers = jax.random.normal(kc, (N, 3), jnp.float32) * 2.0     # dataset.centers[idxs_b]
    descriptors = jax.random.normal(kd, (N, DESC), jnp.float32)
    params = init_params(kp, DESC)

    out = gcn_neck_forward(centers, descriptors, params, RADIUS)
    out = jax.block_until_ready(out)

    ref = jax.block_until_ready(reference(centers, descriptors, params, RADIUS))
    np.testing.assert_allclose(np.asarray(out), np.asarray(ref), rtol=1e-4, atol=1e-4)

    print("KERNEL_OK")
</pallas_src>

<mosaic_0001>
module attributes {stable_mosaic.version = 11 : i64} {
  func.func @_lin_kernel(%arg0: i32, %arg1: memref<16x128xf32, #tpu.memory_space<vmem>>, %arg2: memref<128x128xf32, #tpu.memory_space<vmem>>, %arg3: memref<16x128xf32, #tpu.memory_space<vmem>>) attributes {dimension_semantics = [#tpu.dimension_semantics<parallel>], iteration_bounds = array<i64: 1>, scalar_prefetch = 0 : i64, scratch_operands = 0 : i64, tpu.core_type = #tpu.core_type<tc>, window_params = [{transform_indices = @transform_0, window_bounds = array<i64: 16, 128>}, {pipeline_mode = #tpu.pipeline_mode<synchronous>, transform_indices = @transform_1, window_bounds = array<i64: 128, 128>}, {transform_indices = @transform_2, window_bounds = array<i64: 16, 128>}]} {
    %c0 = arith.constant 0 : index
    %c0_0 = arith.constant 0 : index
    %0 = vector.load %arg1[%c0, %c0_0] : memref<16x128xf32, #tpu.memory_space<vmem>>, vector<16x128xf32>
    %c0_1 = arith.constant 0 : index
    %c0_2 = arith.constant 0 : index
    %1 = vector.load %arg2[%c0_1, %c0_2] : memref<128x128xf32, #tpu.memory_space<vmem>>, vector<128x128xf32>
    %cst = arith.constant dense<0.000000e+00> : vector<16x128xf32>
    %2 = tpu.matmul %0, %1, %cst {dimension_numbers = #tpu.dot_dimension_numbers<[1], [1], [0], [0], [0, 0, 1, 0], [], []>} : vector<16x128xf32>, vector<128x128xf32>, vector<16x128xf32> -> vector<16x128xf32>
    %c0_3 = arith.constant 0 : index
    %c0_4 = arith.constant 0 : index
    %3 = vector.load %arg3[%c0_3, %c0_4] : memref<16x128xf32, #tpu.memory_space<vmem>>, vector<16x128xf32>
    tpu.vector_store %arg3[%c0_3, %c0_4], %2 {strides = array<i32>} : memref<16x128xf32, #tpu.memory_space<vmem>>, vector<16x128xf32>,
    return
  }
  func.func @transform_0(%arg0: i32) -> (i32, i32) {
    %c0_i32 = arith.constant 0 : i32
    %c0_i32_0 = arith.constant 0 : i32
    return %arg0, %c0_i32 : i32, i32
  }
  func.func @transform_1(%arg0: i32) -> (i32, i32) {
    %c0_i32 = arith.constant 0 : i32
    %c0_i32_0 = arith.constant 0 : i32
    %c0_i32_1 = arith.constant 0 : i32
    return %c0_i32, %c0_i32_0 : i32, i32
  }
  func.func @transform_2(%arg0: i32) -> (i32, i32) {
    %c0_i32 = arith.constant 0 : i32
    %c0_i32_0 = arith.constant 0 : i32
    return %arg0, %c0_i32 : i32, i32
  }
}

</mosaic_0001>

<bundles_post_ra>
// kernel: tpu_custom_call.1
= control target key start
LH: loop header
LB: loop body
LE: loop exit
PB: predicated region body
PF: predicated region fallthrough
CT: control target
= control target key end

     0   :  { %7 = vsyncpa [#allocation3], 0  ;;  %s244_s0 = inlined_call_operand.hbm [shape: f32[16,128], index: 0, kind: input, shape index: {}]   ;;  %s245_s1 = inlined_call_operand.hbm [shape: f32[128,128], index: 1, kind: input, shape index: {}]   ;;  %s246_s2 = inlined_call_operand.hbm [shape: f32[16,128], index: 2, kind: output, shape index: {}]  }
   0x1   :  { %8 = vsyncpa [#allocation6], 0 }
   0x2   :  { %9 = vsyncpa [#allocation4], 0  ;;  %s14_s11 = sshll.u32 %s244_s0, 4  ;;  %s206_s12 = smov [#allocation2]   ;;  %s15_s11 = int_to_ptr.hbm [resolvable:$true] %s14_s11 }
   0x3   :  { %s16_s13 = sshll.u32 %s206_s12, 4  ;;  %s27_s16 = sshll.u32 %s245_s1, 4  ;;  %s17_s13 = int_to_ptr.vmem [resolvable:$true] %s16_s13  ;;  %s28_s16 = int_to_ptr.hbm [resolvable:$true] %s27_s16 }
   0x4   :  { %s207_s17 = smov 128   ;;  %s208_s18 = smov 8  }
   0x5   :  { %22 = dma.hbm_to_vmem [thread:$0]  %s15_s11, 256, %s17_s13, [#allocation3], %s207_s17, %s207_s17, %s208_s18  }
   0x6   :  { %s209_s19 = smov [#allocation5]  }
   0x7   :  { %s29_s20 = sshll.u32 %s209_s19, 4  ;;  %s30_s20 = int_to_ptr.vmem [resolvable:$true] %s29_s20 }
   0x8   :  { %35 = dma.hbm_to_vmem [thread:$0]  %s28_s16, 2048, %s30_s20, [#allocation6], %s207_s17, %s207_s17, %s208_s18  }
   0x9   :  { %200 = dma.done.wait [#allocation3], 256  }
   0xa   :  { %201 = vsyncadd [#allocation3], 4294967040 }
   0xb   :  { %202 = dma.done.wait [#allocation6], 2048  }
   0xc   :  { %203 = vsyncadd [#allocation6], 4294965248  ;;  %v61_v0 = vld [vmem:[#allocation5 + $0x78] sm:$0xff]  ;;  %v60_v1 = vld [vmem:[#allocation5 + $0x70] sm:$0xff]  ;;  %s210_s0 = smov [#allocation7]   ;;  %s93_s23 = sshll.u32 %s246_s2, 4  ;;  %s94_s23 = int_to_ptr.hbm [resolvable:$true] %s93_s23 }
   0xd   :  { %62 = vmatpush.xpose.msra.mxu0 %v61_v0  ;;  %107 = vmatpush.xpose.msra.mxu1 %v61_v0  ;;  %v59_v2 = vld [vmem:[#allocation5 + $0x68] sm:$0xff]  ;;  %v58_v3 = vld [vmem:[#allocation5 + $0x60] sm:$0xff]  ;;  %v57_v4 = vld [vmem:[#allocation5 + $0x58] sm:$0xff]  ;;  %s91_s1 = sshll.u32 %s210_s0, 4  ;;  %s92_s1 = int_to_ptr.vmem [resolvable:$true] %s91_s1 }
   0xe   :  { %v56_v5 = vld [vmem:[#allocation5 + $0x50] sm:$0xff]  ;;  %v55_v6 = vld [vmem:[#allocation5 + $0x48] sm:$0xff]  ;;  %v54_v7 = vld [vmem:[#allocation5 + $0x40] sm:$0xff] }
   0xf   :  { %v53_v8 = vld [vmem:[#allocation5 + $0x38] sm:$0xff]  ;;  %v52_v9 = vld [vmem:[#allocation5 + $0x30] sm:$0xff]  ;;  %v51_v10 = vld [vmem:[#allocation5 + $0x28] sm:$0xff] }
  0x10   :  { %v50_v11 = vld [vmem:[#allocation5 + $0x20] sm:$0xff]  ;;  %v49_v12 = vld [vmem:[#allocation5 + $0x18] sm:$0xff]  ;;  %v48_v13 = vld [vmem:[#allocation5 + $0x10] sm:$0xff] }
  0x11   :  { %63 = vmatpush.xpose.msra.mxu0 %v60_v1  ;;  %108 = vmatpush.xpose.msra.mxu1 %v60_v1  ;;  %v47_v14 = vld [vmem:[#allocation5 + $0x8] sm:$0xff]  ;;  %v46_v15 = vld [vmem:[#allocation5] sm:$0xff]  ;;  %v44_v16 = vld [vmem:[#allocation2] sm:$0xff] }
  0x12   :  { %v45_v17 = vld [vmem:[#allocation2 + $0x8] sm:$0xff] }
  0x15   :  { %64 = vmatpush.xpose.msra.mxu0 %v59_v2  ;;  %109 = vmatpush.xpose.msra.mxu1 %v59_v2 }
  0x19   :  { %65 = vmatpush.xpose.msra.mxu0 %v58_v3  ;;  %110 = vmatpush.xpose.msra.mxu1 %v58_v3 }
  0x1d   :  { %66 = vmatpush.xpose.msra.mxu0 %v57_v4  ;;  %111 = vmatpush.xpose.msra.mxu1 %v57_v4 }
  0x21   :  { %67 = vmatpush.xpose.msra.mxu0 %v56_v5  ;;  %112 = vmatpush.xpose.msra.mxu1 %v56_v5 }
  0x25   :  { %68 = vmatpush.xpose.msra.mxu0 %v55_v6  ;;  %113 = vmatpush.xpose.msra.mxu1 %v55_v6 }
  0x29   :  { %69 = vmatpush.xpose.msra.mxu0 %v54_v7  ;;  %114 = vmatpush.xpose.msra.mxu1 %v54_v7 }
  0x2d   :  { %70 = vmatpush.xpose.msra.mxu0 %v53_v8  ;;  %115 = vmatpush.xpose.msra.mxu1 %v53_v8 }
  0x31   :  { %71 = vmatpush.xpose.msra.mxu0 %v52_v9  ;;  %116 = vmatpush.xpose.msra.mxu1 %v52_v9 }
  0x35   :  { %72 = vmatpush.xpose.msra.mxu0 %v51_v10  ;;  %117 = vmatpush.xpose.msra.mxu1 %v51_v10 }
  0x39   :  { %73 = vmatpush.xpose.msra.mxu0 %v50_v11  ;;  %118 = vmatpush.xpose.msra.mxu1 %v50_v11 }
  0x3d   :  { %74 = vmatpush.xpose.msra.mxu0 %v49_v12  ;;  %119 = vmatpush.xpose.msra.mxu1 %v49_v12 }
  0x41   :  { %75 = vmatpush.xpose.msra.mxu0 %v48_v13  ;;  %120 = vmatpush.xpose.msra.mxu1 %v48_v13 }
  0x45   :  { %76 = vmatpush.xpose.msra.mxu0 %v47_v14  ;;  %121 = vmatpush.xpose.msra.mxu1 %v47_v14 }
  0x49   :  { %77 = vmatpush.xpose.msra.mxu0 %v46_v15  ;;  %122 = vmatpush.xpose.msra.mxu1 %v46_v15 }
  0x4c   :  { %78 = vmatmul.f32.vlgmr.msra.gmra.mxu0 %v44_v16  ;;  %81 = vmatmul.f32.vlgmr.msra.gmra.mxu1 %v45_v17 }
  0xc9   :  { %v79_v18 = vpop.f32.mrf.mxu0  ;;  %v82_v19 = vpop.f32.mrf.mxu1 }
  0xca   :  { %85 = vst [vmem:[#allocation7] sm:$0xff] %v79_v18 }
  0xcb   :  { %86 = vst [vmem:[#allocation7 + $0x8] sm:$0xff] %v82_v19 }
  0xcc   :  { %99 = dma.vmem_to_hbm [thread:$0]  %s92_s1, 256, %s94_s23, [#allocation4], %s207_s17, %s207_s17, %s208_s18  }
  0xcd   :  { %204 = dma.done.wait [#allocation4], 256  }
  0xce   :  { %205 = vsyncadd [#allocation4], 4294967040 }
  0xcf   :  { %104 = vsyncpa [#allocation3], 1 }
  0xd0   :  { %105 = vsyncpa [#allocation6], 1 }
  0xd1   :  { %106 = vsyncpa [#allocation4], 1 }

</bundles_post_ra>
